<compile_context>
chip_gen: v7x
topology: tpu7x:2x2x1
jax: 0.10.0
libtpu: 0.0.40
codegen_flags: <defaults>
</compile_context>

<pallas_src>
from functools import partial

import jax
import jax.numpy as jnp
from jax.experimental import pallas as pl
from jax.experimental.pallas import tpu as pltpu

_LANES = 128
_TARGET_BLOCK_BYTES = 4 * 1024 * 1024   # ~4 MiB per block; 4 buffers -> 16 MiB VMEM
_VMEM_LIMIT_BYTES = 32 * 1024 * 1024    # raise v5e's 16 MiB default; fine on v6e/v7x
_SMALL_INPUT_BYTES = 256 * 1024         # below this, fused XLA elementwise is faster


def _gauss_kernel(params_ref, x_ref, o_ref):
    # params_ref lives in SMEM: [mu, inv] with inv = -1 / (2 * sigma^2).
    mu = params_ref[0]
    inv = params_ref[1]
    diff = x_ref[...].astype(jnp.float32) - mu
    # sub + mul + mul on the VPU, exp on the EUP; purely HBM-bandwidth bound.
    o_ref[...] = jnp.exp(diff * diff * inv).astype(o_ref.dtype)


def _round_up(x: int, m: int) -> int:
    return ((x + m - 1) // m) * m


@partial(jax.jit, static_argnames=("use_pallas",))
def gauss_member_func(x, mu, sigma, *, use_pallas=None):
    """Elementwise y = exp(-(x - mu)^2 / (2 * sigma^2)) (GaussMemberFunc.forward)."""
    mu = jnp.asarray(mu, jnp.float32)
    sigma = jnp.asarray(sigma, jnp.float32)
    inv = -0.5 / (sigma * sigma)

    nbytes = x.size * x.dtype.itemsize
    if use_pallas is None:
        use_pallas = nbytes >= _SMALL_INPUT_BYTES
    if not use_pallas:
        # Tiny inputs: pallas_call / custom-call overhead dominates; let XLA fuse.
        return jnp.exp(jnp.square(x.astype(jnp.float32) - mu) * inv).astype(x.dtype)

    orig_shape = x.shape
    orig_dtype = x.dtype
    n = x.size

    flat = x.reshape(-1)
    # Pad only the <128-element lane tail so the (rows, 128) reshape is exact.
    # (Padded tail produces exp(mu^2 * inv) <= 1 and is sliced off below.)
    tail = n % _LANES
    padded_n = n if tail == 0 else n + (_LANES - tail)
    if padded_n != n:
        flat = jnp.pad(flat, (0, padded_n - n))
    rows = padded_n // _LANES
    x2d = flat.reshape(rows, _LANES)

    # Native sublane packing: 8 rows (f32), 16 (bf16/f16), 32 (int8/fp8).
    itemsize = orig_dtype.itemsize
    sub = max(8, 8 * (4 // itemsize))
    # ~4 MiB blocks, but keep >= 2 blocks so both v7x TensorCores get work.
    tile_r_max = max(sub, (_TARGET_BLOCK_BYTES // (_LANES * itemsize)) // sub * sub)
    tile_r = min(tile_r_max, _round_up(pl.cdiv(rows, 2), sub))
    grid = (pl.cdiv(rows, tile_r),)   # ragged edge block is masked by Pallas

    params = jnp.stack([mu, inv]).astype(jnp.float32)   # -> SMEM

    out2d = pl.pallas_call(
        _gauss_kernel,
        out_shape=jax.ShapeDtypeStruct((rows, _LANES), orig_dtype),
        grid_spec=pltpu.PrefetchScalarGridSpec(
            num_scalar_prefetch=0,
            grid=grid,
            in_specs=[
                pl.BlockSpec(memory_space=pltpu.MemorySpace.SMEM),
                pl.BlockSpec((tile_r, _LANES), lambda i: (i, 0)),
            ],
            out_specs=pl.BlockSpec((tile_r, _LANES), lambda i: (i, 0)),
        ),
        compiler_params=pltpu.CompilerParams(
            dimension_semantics=("parallel",),
            vmem_limit_bytes=_VMEM_LIMIT_BYTES,
        ),
    )(params, x2d)

    out_flat = out2d.reshape(-1)
    if padded_n != n:
        out_flat = out_flat[:n]
    return out_flat.reshape(orig_shape)


if __name__ == "__main__":
    key = jax.random.PRNGKey(0)
    k1, k2, k3 = jax.random.split(key, 3)

    mu, sigma = 0.5, 1.25

    def ref(x, mu, sigma):
        xf = x.astype(jnp.float32)
        return jnp.exp(-jnp.square(xf - mu) / (2.0 * sigma ** 2)).astype(x.dtype)

    # 1) Small NCHW input (module-sized), forced through the Pallas path.
    x_small = jax.random.normal(k1, (2, 4, 16, 16), dtype=jnp.float32)
    y_small = jax.block_until_ready(gauss_member_func(x_small, mu, sigma, use_pallas=True))
    assert y_small.shape == x_small.shape and y_small.dtype == x_small.dtype
    assert jnp.allclose(y_small, ref(x_small, mu, sigma), atol=1e-5, rtol=1e-5)

    # 2) Same small input via the auto path (plain-XLA fallback).
    y_auto = jax.block_until_ready(gauss_member_func(x_small, mu, sigma))
    assert jnp.allclose(y_auto, ref(x_small, mu, sigma), atol=1e-5, rtol=1e-5)

    # 3) Larger ragged input (size not a multiple of 128): multi-block Pallas path
    #    with a masked edge block and a tiny lane-tail pad.
    x_big = jax.random.normal(k2, (3, 5, 67, 129), dtype=jnp.float32)
    y_big = jax.block_until_ready(gauss_member_func(x_big, mu, sigma))
    assert jnp.allclose(y_big, ref(x_big, mu, sigma), atol=1e-5, rtol=1e-5)

    # 4) bf16 input exercises the 16-row sublane packing path.
    x_bf16 = jax.random.normal(k3, (2, 4, 32, 64), dtype=jnp.bfloat16)
    y_bf16 = jax.block_until_ready(gauss_member_func(x_bf16, mu, sigma, use_pallas=True))
    assert jnp.allclose(y_bf16.astype(jnp.float32),
                        ref(x_bf16, mu, sigma).astype(jnp.float32),
                        atol=2e-2, rtol=2e-2)

    print("KERNEL_OK")
</pallas_src>

<mosaic_0001>
module attributes {stable_mosaic.version = 11 : i64} {
  func.func @_gauss_kernel(%arg0: i32, %arg1: memref<2xf32, #tpu.memory_space<smem>>, %arg2: memref<8x128xf32, #tpu.memory_space<vmem>>, %arg3: memref<8x128xf32, #tpu.memory_space<vmem>>) attributes {dimension_semantics = [#tpu.dimension_semantics<parallel>], iteration_bounds = array<i64: 2>, scalar_prefetch = 0 : i64, scratch_operands = 0 : i64, tpu.core_type = #tpu.core_type<tc>, window_params = [{transform_indices = @transform_0, window_bounds = array<i64: 2>}, {transform_indices = @transform_1, window_bounds = array<i64: 8, 128>}, {transform_indices = @transform_2, window_bounds = array<i64: 8, 128>}]} {
    %c0 = arith.constant 0 : index
    %0 = memref.load %arg1[%c0] : memref<2xf32, #tpu.memory_space<smem>>
    %c1 = arith.constant 1 : index
    %1 = memref.load %arg1[%c1] : memref<2xf32, #tpu.memory_space<smem>>
    %c0_0 = arith.constant 0 : index
    %c0_1 = arith.constant 0 : index
    %2 = vector.load %arg2[%c0_0, %c0_1] : memref<8x128xf32, #tpu.memory_space<vmem>>, vector<8x128xf32>
    %3 = vector.broadcast %0 : f32 to vector<8x128xf32>
    %4 = arith.subf %2, %3 : vector<8x128xf32>
    %5 = arith.mulf %4, %4 : vector<8x128xf32>
    %6 = vector.broadcast %1 : f32 to vector<8x128xf32>
    %7 = arith.mulf %5, %6 : vector<8x128xf32>
    %8 = math.exp %7 : vector<8x128xf32>
    %c0_2 = arith.constant 0 : index
    %c0_3 = arith.constant 0 : index
    %9 = vector.load %arg3[%c0_2, %c0_3] : memref<8x128xf32, #tpu.memory_space<vmem>>, vector<8x128xf32>
    tpu.vector_store %arg3[%c0_2, %c0_3], %8 {strides = array<i32>} : memref<8x128xf32, #tpu.memory_space<vmem>>, vector<8x128xf32>,
    return
  }
  func.func @transform_0(%arg0: i32) -> i32 {
    %c0_i32 = arith.constant 0 : i32
    %c0_i32_0 = arith.constant 0 : i32
    return %c0_i32 : i32
  }
  func.func @transform_1(%arg0: i32) -> (i32, i32) {
    %c0_i32 = arith.constant 0 : i32
    %c0_i32_0 = arith.constant 0 : i32
    return %arg0, %c0_i32 : i32, i32
  }
  func.func @transform_2(%arg0: i32) -> (i32, i32) {
    %c0_i32 = arith.constant 0 : i32
    %c0_i32_0 = arith.constant 0 : i32
    return %arg0, %c0_i32 : i32, i32
  }
}

</mosaic_0001>

<bundles_post_ra>
// kernel: gauss_member_func.1
= control target key start
LH: loop header
LB: loop body
LE: loop exit
PB: predicated region body
PF: predicated region fallthrough
CT: control target
= control target key end

     0   :  { %7 = vsyncpa [#allocation3], 0  ;;  %s305_s9 = smov 0   ;;  %s336_s0 = inlined_call_operand.vmem [shape: f32[2], index: 0, kind: input, shape index: {}]   ;;  %s337_s1 = inlined_call_operand.vmem [shape: f32[16,128], index: 1, kind: input, shape index: {}]   ;;  %s338_s2 = inlined_call_operand.vmem [shape: f32[16,128], index: 2, kind: output, shape index: {}]  }
   0x1 LB: > { %s229_s10 = sadd.s32 4294967295, %s287_s9   ;;  %p231_p0 = scmp.ge.s32.totalorder %s287_s9, 1  ;;  %s287_s9 = sphi %s305_s9, %s13_s9  }
   0x2   : > { %p91_p1 = scmp.lt.s32.totalorder %s287_s9, 3  ;;  %s104_s13 = sshll.u32 %s336_s0, 4  ;;  %s105_s13 = int_to_ptr.vmem [resolvable:$true] %s104_s13 }
   0x3   : > { %p249_p3 = scmp.eq.s32.totalorder %s229_s10, 0  ;;  %s262_s15 = scalar_lea.vmem %s105_s13, 16 }
   0x4   : > { %p316_p2 = pnand %p231_p0, %p91_p1  ;;  %p263_p6 = scmp.ne.s32.totalorder %s105_s13, %s262_s15 }
   0x5   : > { %p270_p10 = scmp.lt.s32.totalorder %s105_s13, %s105_s13  ;;  %p271_p11 = scmp.lt.s32.totalorder %s262_s15, %s262_s15 }
   0x6   : > { %p245_p4 = pneg %p316_p2 }
   0x7   : > { %p272_p12 = por %p271_p11, %p270_p10 }
   0x8   : > { %p246_p5 = pnand %p249_p3, %p245_p4 }
   0xa   : > { %p264_p7 = pneg %p246_p5 }
   0xc   : > { %p265_p8 = pnand %p264_p7, %p263_p6 }
   0xe   : > { %p266_p9 = pneg %p265_p8 }
  0x10   : > { %p273_p13 = pnand %p272_p12, %p266_p9 }
  0x12   : > { %276 = shalt.err (!%p273_p13)
}
  0x13   : > { %s289_s16 = smov [#allocation2]   ;;  %124 = sbr.rel (%p316_p2) target bundleno = 56 (0x38), region = 28 }
  0x14   : > { %248 = dma.vmem_to_smem (!%p246_p5), %s105_s13, 16, %s289_s16, [#allocation3]  }
  0x1a   : > { %282 = dma.done.wait (%p249_p3), [#allocation3], 16  }
  0x1b   : > { %284 = vsyncadd (%p249_p3), [#allocation3], 4294967280 }
  0x1c   : > { %130 = sfence }
  0x1d   : > { %p145_p0 = scmp.lt.s32.totalorder %s229_s10, 1  ;;  %s153_s17 = sld [smem:[#allocation2]] }
  0x1e   : > { %s238_s18 = sld [smem:[#allocation2 + $0x1]] }
  0x1f   : > { %s341_s10 = smov (!%p145_p0, %s229_s10), 1 }
  0x20   : > { %s236_s19 = sshll.u32 %s341_s10, 3 }
  0x21   : > { %s148_s22 = scalar_lea.vmem %s337_s1, %s236_s19  ;;  %s152_s25 = scalar_lea.vmem %s338_s2, %s236_s19 }
  0x22   : > { %v155_v0 = vld [vmem:[%s148_s22] sm:$0xff] }
  0x23   : > { %v156_v1 = vstv %s153_s17 }
  0x24   : > { %v157_v2 = vsub.f32 %v155_v0, %v156_v1  ;;  %v159_v3 = vstv %s238_s18 }
  0x26   : > { %v158_v4 = vmul.f32 %v157_v2, %v157_v2 }
  0x28   : > { %v160_v5 = vmul.f32 %v159_v3, %v158_v4 }
  0x2a   : > { %v161_v6 = vmul.f32 1.442695, %v160_v5 }
  0x2c   : > { %260 = vpow2.f32 %v161_v6 }
  0x36   : > { %v261_v7 = vpop.eup %260 }
  0x37   : > { %163 = vst [vmem:[%s152_s25] sm:$0xff] %v261_v7 }
  0x38 PF: > { %s13_s9 = sadd.s32 1, %s287_s9  }
  0x39   : > { %p10_p1 = scmp.ge.s32.totalorder %s13_s9, 4  }
  0x3b   :  { %12 = sbr.rel (!%p10_p1) target bundleno = 1 (0x1), region = 63 }
  0x42   :  { %183 = vsyncpa [#allocation3], 1 }
  0x43   :  { %185 = vsyncpa [#allocation3 + $0x1], 1 }

</bundles_post_ra>
